<compile_context>
chip_gen: v5e
topology: v5e:2x2
jax: 0.10.0
libtpu: 0.0.40
codegen_flags: <defaults>
</compile_context>

<pallas_src>
import functools

import jax
import jax.numpy as jnp
from jax.experimental import pallas as pl
from jax.experimental.pallas import tpu as pltpu

_LANES = 128


def _vmem_budget_bytes():
    """~75% of the chip's per-core VMEM (conservative fallback = v7x 64 MiB)."""
    cap = 64 * 1024 * 1024
    try:
        cap = int(pltpu.get_tpu_info().vmem_capacity_bytes)
    except Exception:
        pass
    return max(32 * 1024 * 1024, (3 * cap) // 4)


# ----------------------------------------------------------------------------
# Fast path: whole slab resident in VMEM (grid-less -> single buffered).
# ----------------------------------------------------------------------------
def _normalise_fast_kernel(x_ref, o_ref, *, n_elements):
    xv = x_ref[...].astype(jnp.float32)
    mean_sq = jnp.sum(xv * xv) / jnp.float32(n_elements)
    inv = jax.lax.rsqrt(mean_sq + jnp.float32(1e-6))
    # Re-read from VMEM for the store instead of keeping the whole-slab f32
    # copy live across the reduction (halves vreg/VMEM pressure for bf16 in).
    o_ref[...] = (x_ref[...].astype(jnp.float32) * inv).astype(o_ref.dtype)


# ----------------------------------------------------------------------------
# Tiled path, pass 1: per-tile partial sum of squares -> (8, 128) vreg slab.
# ----------------------------------------------------------------------------
def _partial_sumsq_kernel(x_ref, psum_ref, *, rows_total, tile_rows, mask_tail):
    xv = x_ref[...].astype(jnp.float32)
    if mask_tail:
        # Last block may be partial: rows beyond `rows_total` hold stale VMEM
        # data -> zero them before squaring.  (Lane-ragged sizes were zero
        # padded in the wrapper, so a row-level mask is always sufficient.)
        row_ids = (pl.program_id(0) * tile_rows
                   + jax.lax.broadcasted_iota(jnp.int32, xv.shape, 0))
        xv = jnp.where(row_ids < rows_total, xv, 0.0)
    sq = xv * xv
    psum_ref[...] = jnp.sum(sq.reshape(-1, 8, _LANES), axis=0)


# ----------------------------------------------------------------------------
# Tiled path, pass 2: scale every tile by the scalar-prefetched 1/const.
# ----------------------------------------------------------------------------
def _scale_kernel(inv_ref, x_ref, o_ref):
    inv = inv_ref[0]
    # f32 math keeps v5e (no bf16 VALU) happy; kernel is HBM-bound anyway.
    o_ref[...] = (x_ref[...].astype(jnp.float32) * inv).astype(o_ref.dtype)


def normal_layer_fixed_average_power(x, tile_rows=4096, fast_path_bytes=None,
                                     vmem_limit_bytes=None):
    """Pallas equivalent of Normal_Layer_FixedAveragePower.forward."""
    orig_shape = x.shape
    dtype = x.dtype
    n = x.size
    if n == 0:
        return x

    budget = int(vmem_limit_bytes) if vmem_limit_bytes is not None \
        else _vmem_budget_bytes()
    fast_cap = fast_path_bytes if fast_path_bytes is not None else budget // 5

    rows = pl.cdiv(n, _LANES)
    pad = rows * _LANES - n

    xf = jnp.ravel(x)                      # free (no copy) for contiguous x
    if pad:
        # Lane-ragged sizes only (< 128 extra zeros, but still one HBM copy);
        # zeros contribute nothing to sum(x^2) and the mean uses true n.
        xf = jnp.pad(xf, (0, pad))
    x2d = xf.reshape(rows, _LANES)         # free reshape

    slab_bytes = rows * _LANES * x2d.dtype.itemsize

    if rows < 8 or slab_bytes <= fast_cap:
        # ---- fast path: 1 read + 1 write, whole slab in VMEM -------------
        out2d = pl.pallas_call(
            functools.partial(_normalise_fast_kernel, n_elements=float(n)),
            out_shape=jax.ShapeDtypeStruct((rows, _LANES), dtype),
            compiler_params=pltpu.CompilerParams(vmem_limit_bytes=budget),
        )(x2d)
    else:
        # ---- tiled path: parallel reduce pass + parallel scale pass ------
        tile_rows = max(8, (int(tile_rows) // 8) * 8)
        tile_rows = min(tile_rows, (rows // 8) * 8)   # block never > array
        num_tiles = pl.cdiv(rows, tile_rows)
        mask_tail = (rows % tile_rows) != 0

        psum = pl.pallas_call(
            functools.partial(_partial_sumsq_kernel, rows_total=rows,
                              tile_rows=tile_rows, mask_tail=mask_tail),
            out_shape=jax.ShapeDtypeStruct((num_tiles * 8, _LANES),
                                           jnp.float32),
            grid_spec=pltpu.PrefetchScalarGridSpec(
                num_scalar_prefetch=0,
                grid=(num_tiles,),
                in_specs=[pl.BlockSpec((tile_rows, _LANES),
                                       lambda t: (t, 0))],
                out_specs=pl.BlockSpec((8, _LANES), lambda t: (t, 0)),
            ),
            compiler_params=pltpu.CompilerParams(
                dimension_semantics=("parallel",),   # megacore-safe on v7x
                vmem_limit_bytes=budget),
        )(x2d)

        # Tiny (num_tiles*8*128 elements) combine + rsqrt in plain XLA.
        mean_sq = jnp.sum(psum, dtype=jnp.float32) / jnp.float32(n)
        inv = jax.lax.rsqrt(mean_sq + jnp.float32(1e-6))
        inv = jnp.reshape(inv, (1,)).astype(jnp.float32)

        out2d = pl.pallas_call(
            _scale_kernel,
            out_shape=jax.ShapeDtypeStruct((rows, _LANES), dtype),
            grid_spec=pltpu.PrefetchScalarGridSpec(
                num_scalar_prefetch=1,                # inv -> SMEM scalar
                grid=(num_tiles,),
                in_specs=[pl.BlockSpec((tile_rows, _LANES),
                                       lambda t, inv_ref: (t, 0))],
                out_specs=pl.BlockSpec((tile_rows, _LANES),
                                       lambda t, inv_ref: (t, 0)),
            ),
            compiler_params=pltpu.CompilerParams(
                dimension_semantics=("parallel",),   # megacore-safe on v7x
                vmem_limit_bytes=budget),
        )(inv, x2d)

    out_flat = out2d.reshape(-1)           # free
    if pad:
        out_flat = out_flat[:n]            # only for lane-ragged sizes
    return out_flat.reshape(orig_shape)    # free


if __name__ == "__main__":
    key = jax.random.PRNGKey(0)
    x = jax.random.normal(key, (2, 4, 16, 16), dtype=jnp.float32)

    def ref(t):
        return t / jnp.sqrt(jnp.mean(jnp.abs(t) ** 2) + 1e-6)

    # small input -> single-pass fast path (no pad, no slice)
    y_fast = jax.block_until_ready(normal_layer_fixed_average_power(x))
    # force the two-pass tiled path on the same input
    y_tiled = jax.block_until_ready(
        normal_layer_fixed_average_power(x, tile_rows=8, fast_path_bytes=0))
    assert y_fast.shape == x.shape and y_fast.dtype == x.dtype
    assert jnp.allclose(y_fast, ref(x), rtol=1e-5, atol=1e-5)
    assert jnp.allclose(y_tiled, ref(x), rtol=1e-5, atol=1e-5)

    # lane-ragged element count (numel % 128 != 0) -> minimal-pad fallback
    x2 = jax.random.normal(jax.random.PRNGKey(1), (3, 5, 7), dtype=jnp.float32)
    y2 = jax.block_until_ready(normal_layer_fixed_average_power(x2))
    y2_t = jax.block_until_ready(
        normal_layer_fixed_average_power(x2, tile_rows=8, fast_path_bytes=0))
    assert jnp.allclose(y2, ref(x2), rtol=1e-5, atol=1e-5)
    assert jnp.allclose(y2_t, ref(x2), rtol=1e-5, atol=1e-5)

    # rows not a multiple of the tile -> exercises in-kernel tail masking
    x3 = jax.random.normal(jax.random.PRNGKey(2), (5, 200, 128),
                           dtype=jnp.float32)
    y3 = jax.block_until_ready(
        normal_layer_fixed_average_power(x3, tile_rows=512, fast_path_bytes=0))
    assert jnp.allclose(y3, ref(x3), rtol=1e-5, atol=1e-5)

    print("KERNEL_OK")
</pallas_src>

<mosaic_0001>
module attributes {stable_mosaic.version = 11 : i64} {
  func.func @_normalise_fast_kernel(%arg0: memref<16x128xf32, #tpu.memory_space<vmem>>, %arg1: memref<16x128xf32, #tpu.memory_space<vmem>>) attributes {dimension_semantics = [], scalar_prefetch = 0 : i64, scratch_operands = 0 : i64, tpu.core_type = #tpu.core_type<tc>} {
    %c0 = arith.constant 0 : index
    %c0_0 = arith.constant 0 : index
    %0 = vector.load %arg0[%c0, %c0_0] : memref<16x128xf32, #tpu.memory_space<vmem>>, vector<16x128xf32>
    %1 = arith.mulf %0, %0 : vector<16x128xf32>
    %2 = vector.shape_cast %1 : vector<16x128xf32> to vector<1x16x128xf32>
    %cst = arith.constant dense<0.000000e+00> : vector<1xf32>
    %3 = vector.multi_reduction <add>, %2, %cst [1, 2] : vector<1x16x128xf32> to vector<1xf32>
    %4 = vector.shape_cast %3 : vector<1xf32> to vector<1x1x1xf32>
    %5 = vector.extract %4[0, 0, 0] : f32 from vector<1x1x1xf32>
    %cst_1 = arith.constant 2.048000e+03 : f32
    %6 = arith.divf %5, %cst_1 : f32
    %cst_2 = arith.constant 9.99999997E-7 : f32
    %7 = arith.addf %6, %cst_2 : f32
    %8 = math.rsqrt %7 : f32
    %c0_3 = arith.constant 0 : index
    %c0_4 = arith.constant 0 : index
    %9 = vector.load %arg0[%c0_3, %c0_4] : memref<16x128xf32, #tpu.memory_space<vmem>>, vector<16x128xf32>
    %10 = vector.broadcast %8 : f32 to vector<16x128xf32>
    %11 = arith.mulf %9, %10 : vector<16x128xf32>
    %c0_5 = arith.constant 0 : index
    %c0_6 = arith.constant 0 : index
    %12 = vector.load %arg1[%c0_5, %c0_6] : memref<16x128xf32, #tpu.memory_space<vmem>>, vector<16x128xf32>
    tpu.vector_store %arg1[%c0_5, %c0_6], %11 {strides = array<i32>} : memref<16x128xf32, #tpu.memory_space<vmem>>, vector<16x128xf32>,
    return
  }
}

</mosaic_0001>

<bundles_post_ra>
// kernel: tpu_custom_call.1
= control target key start
LH: loop header
LB: loop body
LE: loop exit
PB: predicated region body
PF: predicated region fallthrough
CT: control target
= control target key end

     0   :  { %6 = vsyncpa [#allocation3], 0  ;;  %s179_s0 = inlined_call_operand.hbm [shape: f32[16,128], index: 0, kind: input, shape index: {}]   ;;  %s180_s1 = inlined_call_operand.hbm [shape: f32[16,128], index: 1, kind: output, shape index: {}]  }
   0x1   :  { %7 = vsyncpa [#allocation4], 0  ;;  %s12_s8 = sshll.u32 %s179_s0, 4  ;;  %s152_s9 = smov [#allocation2]   ;;  %s13_s8 = int_to_ptr.hbm [resolvable:$true] %s12_s8 }
   0x2   :  { %s14_s10 = sshll.u32 %s152_s9, 4  ;;  %s153_s11 = smov 128   ;;  %s15_s10 = int_to_ptr.vmem [resolvable:$true] %s14_s10 }
   0x3   :  { %s154_s12 = smov 8  }
   0x4   :  { %20 = dma.hbm_to_vmem [thread:$0]  %s13_s8, 256, %s15_s10, [#allocation3], %s153_s11, %s153_s11, %s154_s12  }
   0x5   :  { %148 = dma.done.wait [#allocation3], 256  }
   0x6   :  { %149 = vsyncadd [#allocation3], 4294967040  ;;  %v25_v0 = vld [vmem:[#allocation2] sm:$0xff]  ;;  %v26_v1 = vld [vmem:[#allocation2 + $0x8] sm:$0xff]  ;;  %v155_v5 = vmov 2048.0   ;;  %s156_s16 = smov [#allocation5]  }
   0x7   :  { %v27_v2 = vmul.f32 %v25_v0, %v25_v0  ;;  %v28_v3 = vmul.f32 %v26_v1, %v26_v1  ;;  %96 = vrcp.f32 %v155_v5  ;;  %s70_s17 = sshll.u32 %s156_s16, 4  ;;  %s72_s21 = sshll.u32 %s180_s1, 4  ;;  %s71_s17 = int_to_ptr.vmem [resolvable:$true] %s70_s17  ;;  %s73_s21 = int_to_ptr.hbm [resolvable:$true] %s72_s21 }
   0x9   :  { %v29_v4 = vadd.f32 %v28_v3, %v27_v2 }
   0xb   :  { %30 = vadd.xlane.f32.xlu0 %v29_v4 }
   0xd   :  { %v97_v6 = vpop.eup %96 }
   0xe   :  { %v40_v7 = vmul.f32 2048.0, %v97_v6  ;;  %vm44_vm0 = vweird.f32 %v97_v6 }
  0x10   :  { %v41_v8 = vsub.f32 1.0, %v40_v7 }
  0x12   :  { %v42_v12 = vmul.f32 %v97_v6, %v41_v8 }
  0x14   :  { %v43_v15 = vadd.f32 %v97_v6, %v42_v12 }
  0x16   :  { %v45_v18 = vsel %vm44_vm0, %v97_v6, %v43_v15 }
  0x7e   :  { %v31_v9 = vpop.xlane.xlu0 %30 }
  0x7f   :  { %v32_v10 = vrot.slane %v31_v9, 4 }
  0x81   :  { %v33_v11 = vadd.f32 %v32_v10, %v31_v9 }
  0x83   :  { %v34_v13 = vrot.slane %v33_v11, 2 }
  0x85   :  { %v35_v14 = vadd.f32 %v34_v13, %v33_v11 }
  0x87   :  { %v36_v16 = vrot.slane %v35_v14, 1 }
  0x89   :  { %v37_v17 = vadd.f32 %v36_v16, %v35_v14 }
  0x8b   :  { %85 = vpush %v37_v17 }
  0x8c   :  { %87 = vpush %v45_v18 }
  0xbc   :  { %s86_s0 = spop %85 }
  0xbd   :  { %s88_s13 = spop %87 }
  0xbe   :  { %s47_s14 = smul.f32 %s88_s13, %s86_s0 }
  0xc0   :  { %s48_s15 = sadd.f32 1e-06, %s47_s14 }
  0xc2   :  { %v49_v19 = vstv %s48_s15 }
  0xc3   :  { %98 = vrsqrt.f32 %v49_v19  ;;  %vm56_vm2 = vweird.f32 %v49_v19 }
  0xc9   :  { %v99_v20 = vpop.eup %98 }
  0xca   :  { %v51_v21 = vmul.f32 %v99_v20, %v49_v19  ;;  %vm57_vm1 = vweird.f32 %v99_v20 }
  0xcb   :  { %vm58_vm3 = vmor %vm56_vm2, %vm57_vm1 }
  0xcc   :  { %v52_v22 = vmul.f32 %v99_v20, %v51_v21 }
  0xce   :  { %v53_v23 = vmul.f32 0.5, %v52_v22 }
  0xd0   :  { %v54_v24 = vsub.f32 1.5, %v53_v23 }
  0xd2   :  { %v55_v25 = vmul.f32 %v99_v20, %v54_v24 }
  0xd4   :  { %v59_v26 = vsel %vm58_vm3, %v99_v20, %v55_v25 }
  0xd5   :  { %89 = vpush %v59_v26 }
 0x106   :  { %s90_s18 = spop %89 }
 0x107   :  { %v61_v27 = vstv %s90_s18 }
 0x108   :  { %v62_v28 = vmul.f32 %v61_v27, %v25_v0  ;;  %v63_v29 = vmul.f32 %v61_v27, %v26_v1 }
 0x10a   :  { %64 = vst [vmem:[#allocation5] sm:$0xff] %v62_v28 }
 0x10b   :  { %65 = vst [vmem:[#allocation5 + $0x8] sm:$0xff] %v63_v29 }
 0x10c   :  { %78 = dma.vmem_to_hbm [thread:$0]  %s71_s17, 256, %s73_s21, [#allocation4], %s153_s11, %s153_s11, %s154_s12  }
 0x10d   :  { %150 = dma.done.wait [#allocation4], 256  }
 0x10e   :  { %151 = vsyncadd [#allocation4], 4294967040 }
 0x10f   :  { %83 = vsyncpa [#allocation3], 1 }
 0x110   :  { %84 = vsyncpa [#allocation4], 1 }

</bundles_post_ra>
